<compile_context>
chip_gen: v6e
topology: v6e:2x2x1
jax: 0.10.0
libtpu: 0.0.40
codegen_flags: <defaults>
</compile_context>

<pallas_src>
import math

import numpy as np
import jax
import jax.numpy as jnp
from jax.experimental import pallas as pl
from jax.experimental.pallas import tpu as pltpu


# ----------------------------------------------------------------------------
# Small helpers
# ----------------------------------------------------------------------------
def _cdiv(a, b):
    return -(-a // b)


def _round_up(a, b):
    return _cdiv(a, b) * b


def _vmem_capacity_bytes():
    """Generation-aware VMEM capacity; conservative (v7x) fallback."""
    try:
        info = pltpu.get_tpu_info()
        cap = int(getattr(info, "vmem_capacity_bytes", 0))
        if cap > 0:
            return cap
    except Exception:
        pass
    return 64 * 1024 * 1024


# ----------------------------------------------------------------------------
# Filter construction -- mirrors torchaudio's _get_sinc_resample_kernel.
# Computed in float64 numpy, cached as float32 (same as the PyTorch default).
# ----------------------------------------------------------------------------
def _get_sinc_resample_kernel_np(
    orig_freq: int,
    new_freq: int,
    gcd: int,
    lowpass_filter_width: int = 6,
    rolloff: float = 0.99,
    resampling_method: str = "sinc_interp_hann",
    beta=None,
):
    orig_freq = int(orig_freq) // gcd
    new_freq = int(new_freq) // gcd
    if resampling_method not in ("sinc_interp_hann", "sinc_interp_kaiser"):
        raise ValueError(f"Invalid resampling method: {resampling_method}")
    if lowpass_filter_width <= 0:
        raise ValueError("Low pass filter width should be positive.")

    base_freq = min(orig_freq, new_freq) * rolloff
    width = math.ceil(lowpass_filter_width * orig_freq / base_freq)

    idx = np.arange(-width, width + orig_freq, dtype=np.float64)[None, None] / orig_freq
    t = np.arange(0, -new_freq, -1, dtype=np.float64)[:, None, None] / new_freq + idx
    t = t * base_freq
    t = np.clip(t, -lowpass_filter_width, lowpass_filter_width)

    if resampling_method == "sinc_interp_hann":
        window = np.cos(t * math.pi / lowpass_filter_width / 2) ** 2
    else:
        if beta is None:
            beta = 14.769656459379492
        window = np.i0(beta * np.sqrt(1.0 - (t / lowpass_filter_width) ** 2)) / np.i0(beta)

    t = t * math.pi
    scale = base_freq / orig_freq
    safe_t = np.where(t == 0, 1.0, t)
    kernels = np.where(t == 0, 1.0, np.sin(safe_t) / safe_t)
    kernels = kernels * window * scale
    return kernels.astype(np.float32), width  # (new_freq, 1, 2*width + orig_freq)


def _build_block_toeplitz_filter(kernel_np, orig_r, new_r, width, group):
    """(new, 1, K) sinc kernel -> (group*orig + 2*width, group*new) matmul filter.

    out_superframe[g*new + c] = sum_m window[m] * W[m, g*new + c]
    with W[m, g*new + c] = h[c, m - g*orig] on its band, 0 elsewhere.
    """
    h = kernel_np[:, 0, :]                       # (new, K), K = 2*width + orig
    n, K = h.shape
    rows = group * orig_r + 2 * width
    W = np.zeros((rows, group * n), dtype=np.float32)
    for g in range(group):
        W[g * orig_r: g * orig_r + K, g * n: (g + 1) * n] = h.T
    return W


# ----------------------------------------------------------------------------
# Pallas kernel: one row tile per grid step == one large MXU matmul
# (main band) plus one small matmul (halo band), accumulated in f32.
# ----------------------------------------------------------------------------
def _resample_tile_kernel(x_ref, h_ref, wm_ref, wh_ref, o_ref):
    # x_ref : (TS, GO)  main superframe samples (streamed through VMEM)
    # h_ref : (TS, HW)  halo samples (first HW samples of the next superframe)
    # wm_ref: (GO, GN)  main band of the block-Toeplitz sinc filter (resident)
    # wh_ref: (HW, GN)  halo band of the filter (resident)
    # o_ref : (TS, GN)  output superframes, already in final interleaved order
    acc = jnp.dot(x_ref[...], wm_ref[...], preferred_element_type=jnp.float32)
    acc = acc + jnp.dot(h_ref[...], wh_ref[...], preferred_element_type=jnp.float32)
    o_ref[...] = acc.astype(o_ref.dtype)


def _apply_sinc_resample_kernel_pallas(
    waveform, orig_freq, new_freq, gcd_, filt_main, filt_halo, width, group,
    compute_dtype, single_buffer_filter=True,
):
    if not jnp.issubdtype(waveform.dtype, jnp.floating):
        raise TypeError(f"Expected floating point type for waveform, got {waveform.dtype}.")
    o = int(orig_freq) // gcd_
    n = int(new_freq) // gcd_

    shape = waveform.shape
    out_dtype = waveform.dtype
    wav = waveform.reshape(-1, shape[-1]).astype(compute_dtype)
    num_wavs, length = wav.shape

    target_length = int(math.ceil(n * length / o))
    n_frames = _cdiv(target_length, n)

    GO = group * o                 # input samples per superframe (main band)
    GN = group * n                 # output samples per superframe (>= 128)
    HW = 2 * width                 # halo into the next superframe
    n_sf = _cdiv(n_frames, group)  # superframes needed per wav
    S_tot = n_sf + 1               # +1 spare superframe per wav (halo source)
    total_len = S_tot * GO
    R = num_wavs * S_tot           # batch x superframe collapsed into one M axis

    # ---- tile sizing from the TOTAL VMEM footprint (generation-aware) ----
    in_b = np.dtype(compute_dtype).itemsize
    out_b = np.dtype(out_dtype).itemsize
    filt_bytes = 2 * (GO + HW) * GN * in_b              # worst case: double-buffered
    per_row = 2 * (GO + HW) * in_b + 2 * GN * out_b     # 2x in + 2x halo + 2x out bufs
    cap = _vmem_capacity_bytes()
    budget = max(4 << 20, int(cap * 0.6))
    avail = max(per_row * 8, budget - filt_bytes)
    ts = max(8, min(1024, (avail // per_row) // 8 * 8))
    if R > 8:
        # keep >= 2 independent tiles so both v7x TensorCores get work
        ts = min(ts, _round_up(_cdiv(R, 2), 8))
    ts = min(ts, _round_up(R, 8))
    n_tiles = _cdiv(R, ts)
    R_pad = n_tiles * ts

    est_vmem = filt_bytes + per_row * ts
    vmem_limit = int(min(int(cap * 0.9), max(32 << 20, est_vmem + (16 << 20))))

    # ---- host-side framing (fused by XLA under jit) ----
    # torch-style F.pad(width, ...) plus zero-extension up to the framed length.
    wav_ext = jnp.pad(wav, ((0, 0), (width, total_len - width - length)))
    base = wav_ext.reshape(R, GO)
    # Halo band: first HW samples of the *next* superframe row (zeros at the end).
    halo = jnp.concatenate(
        [base[1:, :HW], jnp.zeros((R_pad - R + 1, HW), dtype=compute_dtype)], axis=0)
    if R_pad > R:
        base = jnp.pad(base, ((0, R_pad - R), (0, 0)))

    cost = pl.CostEstimate(
        flops=2 * R_pad * (GO + HW) * GN,
        transcendentals=0,
        bytes_accessed=(in_b * R_pad * (GO + HW)
                        + in_b * (GO + HW) * GN
                        + out_b * R_pad * GN),
    )

    if single_buffer_filter:
        def _filt_spec(shp):
            return pl.BlockSpec(shp, lambda t: (0, 0), pipeline_mode=pl.Buffered(1))
    else:
        def _filt_spec(shp):
            return pl.BlockSpec(shp, lambda t: (0, 0))

    out = pl.pallas_call(
        _resample_tile_kernel,
        out_shape=jax.ShapeDtypeStruct((R_pad, GN), out_dtype),
        grid=(n_tiles,),
        in_specs=[
            pl.BlockSpec((ts, GO), lambda t: (t, 0)),   # streamed main band
            pl.BlockSpec((ts, HW), lambda t: (t, 0)),   # streamed halo band
            _filt_spec((GO, GN)),                       # resident filter (main)
            _filt_spec((HW, GN)),                       # resident filter (halo)
        ],
        out_specs=pl.BlockSpec((ts, GN), lambda t: (t, 0)),
        compiler_params=pltpu.CompilerParams(
            dimension_semantics=("parallel",),
            vmem_limit_bytes=vmem_limit),
        cost_estimate=cost,
    )(base, halo, filt_main, filt_halo)

    # Rows flatten directly into the final frame-major order; the spare
    # superframe per wav lands past target_length and is sliced off.
    res = out[:R].reshape(num_wavs, S_tot * GN)[:, :target_length]
    return res.reshape(shape[:-1] + (target_length,))


class Resample:
    """JAX/Pallas port of torchaudio-style Resample (forward pass only)."""

    def __init__(
        self,
        orig_freq: int = 16000,
        new_freq: int = 16000,
        resampling_method: str = "sinc_interp_hann",
        lowpass_filter_width: int = 6,
        rolloff: float = 0.99,
        beta=None,
        *,
        compute_dtype=jnp.float32,
    ):
        self.orig_freq = int(orig_freq)
        self.new_freq = int(new_freq)
        self.gcd = math.gcd(self.orig_freq, self.new_freq)
        self.resampling_method = resampling_method
        self.lowpass_filter_width = lowpass_filter_width
        self.rolloff = rolloff
        self.beta = beta
        self.compute_dtype = compute_dtype
        self._fns = {}
        self._single_buffer_ok = True
        if self.orig_freq != self.new_freq:
            k, self.width = _get_sinc_resample_kernel_np(
                self.orig_freq, self.new_freq, self.gcd,
                lowpass_filter_width, rolloff, resampling_method, beta)
            self.kernel = k                      # (new, 1, K) float32, torch layout
            o = self.orig_freq // self.gcd
            n = self.new_freq // self.gcd
            # Group G output frames into one "superframe":
            #   * G*new  >= 128      -> lane-dense output stores
            #   * G*orig >= 2*width  -> the halo fits in the next superframe row
            g_lane = 1 if n >= 128 else _cdiv(128, n)
            self.group = max(g_lane, _cdiv(2 * self.width, o), 1)
            W = _build_block_toeplitz_filter(k, o, n, self.width, self.group)
            GO = self.group * o
            self.filt_main = jnp.asarray(W[:GO]).astype(compute_dtype)
            self.filt_halo = jnp.asarray(W[GO:]).astype(compute_dtype)

    def _get_fn(self, single_buffer_filter: bool):
        key = bool(single_buffer_filter)
        if key not in self._fns:
            fm, fh = self.filt_main, self.filt_halo
            of, nf, g = self.orig_freq, self.new_freq, self.gcd
            w, grp, cdt = self.width, self.group, self.compute_dtype

            def fn(waveform):
                return _apply_sinc_resample_kernel_pallas(
                    waveform, of, nf, g, fm, fh, w, grp, cdt,
                    single_buffer_filter=key)

            self._fns[key] = jax.jit(fn)
        return self._fns[key]

    def __call__(self, waveform):
        if self.orig_freq == self.new_freq:
            return waveform
        if self._single_buffer_ok:
            try:
                return self._get_fn(True)(waveform)
            except Exception:
                # pl.Buffered(1) not supported by this build -> default buffering.
                self._single_buffer_ok = False
        return self._get_fn(False)(waveform)


# ----------------------------------------------------------------------------
# Pure-numpy reference (direct translation of the PyTorch forward) for checks.
# ----------------------------------------------------------------------------
def _reference_np(waveform, orig_freq, new_freq, gcd, kernel, width):
    orig_freq = int(orig_freq) // gcd
    new_freq = int(new_freq) // gcd
    shape = waveform.shape
    wav = waveform.reshape(-1, shape[-1])
    num_wavs, length = wav.shape
    wav_pad = np.pad(wav, ((0, 0), (width, width + orig_freq)))
    K = kernel.shape[-1]
    frames = (wav_pad.shape[-1] - K) // orig_freq + 1
    out = np.zeros((num_wavs, new_freq, frames), dtype=np.float32)
    w = kernel[:, 0, :]  # (new_freq, K)
    for f in range(frames):
        seg = wav_pad[:, f * orig_freq: f * orig_freq + K]  # (B, K)
        out[:, :, f] = seg @ w.T
    res = out.transpose(0, 2, 1).reshape(num_wavs, -1)
    target = int(math.ceil(new_freq * length / orig_freq))
    return res[..., :target].reshape(shape[:-1] + (target,))


if __name__ == "__main__":
    key = jax.random.PRNGKey(0)

    # Case 1: small-ratio downsample (4 -> 3), batch=2, channels=4, time=128.
    wav1 = jax.random.normal(key, (2, 4, 128), dtype=jnp.float32)
    rs1 = Resample(orig_freq=4, new_freq=3)
    out1 = jax.block_until_ready(rs1(wav1))
    ref1 = _reference_np(np.asarray(wav1), 4, 3, rs1.gcd,
                         np.asarray(rs1.kernel), rs1.width)
    assert out1.shape == ref1.shape, (out1.shape, ref1.shape)
    np.testing.assert_allclose(np.asarray(out1), ref1, rtol=1e-3, atol=1e-3)

    # Case 2: upsample 16 kHz -> 22.05 kHz, batch=3, time=960 (f32 path).
    wav2 = jax.random.normal(jax.random.PRNGKey(0), (3, 960), dtype=jnp.float32)
    rs2 = Resample(orig_freq=16000, new_freq=22050)
    out2 = jax.block_until_ready(rs2(wav2))
    ref2 = _reference_np(np.asarray(wav2), 16000, 22050, rs2.gcd,
                         np.asarray(rs2.kernel), rs2.width)
    assert out2.shape == ref2.shape, (out2.shape, ref2.shape)
    np.testing.assert_allclose(np.asarray(out2), ref2, rtol=1e-3, atol=1e-3)

    # Case 3: same resample with the bf16 compute path (loose tolerance).
    rs3 = Resample(orig_freq=16000, new_freq=22050, compute_dtype=jnp.bfloat16)
    out3 = jax.block_until_ready(rs3(wav2))
    assert out3.shape == ref2.shape, (out3.shape, ref2.shape)
    np.testing.assert_allclose(np.asarray(out3), ref2, rtol=1e-1, atol=1e-1)

    print("KERNEL_OK")
</pallas_src>

<mosaic_0001>
module attributes {stable_mosaic.version = 11 : i64} {
  func.func @_resample_tile_kernel(%arg0: i32, %arg1: memref<8x172xf32, #tpu.memory_space<vmem>>, %arg2: memref<8x18xf32, #tpu.memory_space<vmem>>, %arg3: memref<172x129xf32, #tpu.memory_space<vmem>>, %arg4: memref<18x129xf32, #tpu.memory_space<vmem>>, %arg5: memref<8x129xf32, #tpu.memory_space<vmem>>) attributes {dimension_semantics = [#tpu.dimension_semantics<parallel>], iteration_bounds = array<i64: 2>, scalar_prefetch = 0 : i64, scratch_operands = 0 : i64, tpu.core_type = #tpu.core_type<tc>, window_params = [{transform_indices = @transform_0, window_bounds = array<i64: 8, 172>}, {transform_indices = @transform_1, window_bounds = array<i64: 8, 18>}, {pipeline_mode = #tpu.pipeline_mode<synchronous>, transform_indices = @transform_2, window_bounds = array<i64: 172, 129>}, {pipeline_mode = #tpu.pipeline_mode<synchronous>, transform_indices = @transform_3, window_bounds = array<i64: 18, 129>}, {transform_indices = @transform_4, window_bounds = array<i64: 8, 129>}]} {
    %c0 = arith.constant 0 : index
    %c0_0 = arith.constant 0 : index
    %0 = vector.load %arg1[%c0, %c0_0] : memref<8x172xf32, #tpu.memory_space<vmem>>, vector<8x172xf32>
    %c0_1 = arith.constant 0 : index
    %c0_2 = arith.constant 0 : index
    %1 = vector.load %arg3[%c0_1, %c0_2] : memref<172x129xf32, #tpu.memory_space<vmem>>, vector<172x129xf32>
    %cst = arith.constant dense<0.000000e+00> : vector<8x129xf32>
    %2 = tpu.matmul %0, %1, %cst {dimension_numbers = #tpu.dot_dimension_numbers<[1], [0], [0], [1], [0, 0, 1, 1], [], []>} : vector<8x172xf32>, vector<172x129xf32>, vector<8x129xf32> -> vector<8x129xf32>
    %c0_3 = arith.constant 0 : index
    %c0_4 = arith.constant 0 : index
    %3 = vector.load %arg2[%c0_3, %c0_4] : memref<8x18xf32, #tpu.memory_space<vmem>>, vector<8x18xf32>
    %c0_5 = arith.constant 0 : index
    %c0_6 = arith.constant 0 : index
    %4 = vector.load %arg4[%c0_5, %c0_6] : memref<18x129xf32, #tpu.memory_space<vmem>>, vector<18x129xf32>
    %cst_7 = arith.constant dense<0.000000e+00> : vector<8x129xf32>
    %5 = tpu.matmul %3, %4, %cst_7 {dimension_numbers = #tpu.dot_dimension_numbers<[1], [0], [0], [1], [0, 0, 1, 1], [], []>} : vector<8x18xf32>, vector<18x129xf32>, vector<8x129xf32> -> vector<8x129xf32>
    %6 = arith.addf %2, %5 : vector<8x129xf32>
    %c0_8 = arith.constant 0 : index
    %c0_9 = arith.constant 0 : index
    %7 = vector.load %arg5[%c0_8, %c0_9] : memref<8x129xf32, #tpu.memory_space<vmem>>, vector<8x129xf32>
    tpu.vector_store %arg5[%c0_8, %c0_9], %6 {strides = array<i32>} : memref<8x129xf32, #tpu.memory_space<vmem>>, vector<8x129xf32>,
    return
  }
  func.func @transform_0(%arg0: i32) -> (i32, i32) {
    %c0_i32 = arith.constant 0 : i32
    %c0_i32_0 = arith.constant 0 : i32
    return %arg0, %c0_i32 : i32, i32
  }
  func.func @transform_1(%arg0: i32) -> (i32, i32) {
    %c0_i32 = arith.constant 0 : i32
    %c0_i32_0 = arith.constant 0 : i32
    return %arg0, %c0_i32 : i32, i32
  }
  func.func @transform_2(%arg0: i32) -> (i32, i32) {
    %c0_i32 = arith.constant 0 : i32
    %c0_i32_0 = arith.constant 0 : i32
    %c0_i32_1 = arith.constant 0 : i32
    return %c0_i32, %c0_i32_0 : i32, i32
  }
  func.func @transform_3(%arg0: i32) -> (i32, i32) {
    %c0_i32 = arith.constant 0 : i32
    %c0_i32_0 = arith.constant 0 : i32
    %c0_i32_1 = arith.constant 0 : i32
    return %c0_i32, %c0_i32_0 : i32, i32
  }
  func.func @transform_4(%arg0: i32) -> (i32, i32) {
    %c0_i32 = arith.constant 0 : i32
    %c0_i32_0 = arith.constant 0 : i32
    return %arg0, %c0_i32 : i32, i32
  }
}

module attributes {stable_mosaic.version = 11 : i64} {
  func.func @_resample_tile_kernel(%arg0: i32, %arg1: memref<8x172xf32, #tpu.memory_space<vmem>>, %arg2: memref<8x18xf32, #tpu.memory_space<vmem>>, %arg3: memref<172x129xf32, #tpu.memory_space<vmem>>, %arg4: memref<18x129xf32, #tpu.memory_space<vmem>>, %arg5: memref<8x129xf32, #tpu.memory_space<vmem>>) attributes {dimension_semantics = [#tpu.dimension_semantics<parallel>], iteration_bounds = array<i64: 2>, scalar_prefetch = 0 : i64, scratch_operands = 0 : i64, tpu.core_type = #tpu.core_type<tc>, window_params = [{transform_indices = @transform_0, window_bounds = array<i64: 8, 172>}, {transform_indices = @transform_1, window_bounds = array<i64: 8, 18>}, {pipeline_mode = #tpu.pipeline_mode<synchronous>, transform_indices = @transform_2, window_bounds = array<i64: 172, 129>}, {pipeline_mode = #tpu.pipeline_mode<synchronous>, transform_indices = @transform_3, window_bounds = array<i64: 18, 129>}, {transform_indices = @transform_4, window_bounds = array<i64: 8, 129>}]} {
    %c0 = arith.constant 0 : index
    %c0_0 = arith.constant 0 : index
    %0 = vector.load %arg1[%c0, %c0_0] : memref<8x172xf32, #tpu.memory_space<vmem>>, vector<8x172xf32>
    %c0_1 = arith.constant 0 : index
    %c0_2 = arith.constant 0 : index
    %1 = vector.load %arg3[%c0_1, %c0_2] : memref<172x129xf32, #tpu.memory_space<vmem>>, vector<172x129xf32>
    %cst = arith.constant dense<0.000000e+00> : vector<8x129xf32>
    %2 = tpu.matmul %0, %1, %cst {dimension_numbers = #tpu.dot_dimension_numbers<[1], [0], [0], [1], [0, 0, 1, 1], [], []>} : vector<8x172xf32>, vector<172x129xf32>, vector<8x129xf32> -> vector<8x129xf32>
    %c0_3 = arith.constant 0 : index
    %c0_4 = arith.constant 0 : index
    %3 = vector.load %arg2[%c0_3, %c0_4] : memref<8x18xf32, #tpu.memory_space<vmem>>, vector<8x18xf32>
    %c0_5 = arith.constant 0 : index
    %c0_6 = arith.constant 0 : index
    %4 = vector.load %arg4[%c0_5, %c0_6] : memref<18x129xf32, #tpu.memory_space<vmem>>, vector<18x129xf32>
    %cst_7 = arith.constant dense<0.000000e+00> : vector<8x129xf32>
    %5 = tpu.matmul %3, %4, %cst_7 {dimension_numbers = #tpu.dot_dimension_numbers<[1], [0], [0], [1], [0, 0, 1, 1], [], []>} : vector<8x18xf32>, vector<18x129xf32>, vector<8x129xf32> -> vector<8x129xf32>
    %6 = arith.addf %2, %5 : vector<8x129xf32>
    %c0_8 = arith.constant 0 : index
    %c0_9 = arith.constant 0 : index
    %7 = vector.load %arg5[%c0_8, %c0_9] : memref<8x129xf32, #tpu.memory_space<vmem>>, vector<8x129xf32>
    tpu.vector_store %arg5[%c0_8, %c0_9], %6 {strides = array<i32>} : memref<8x129xf32, #tpu.memory_space<vmem>>, vector<8x129xf32>,
    return
  }
  func.func @transform_0(%arg0: i32) -> (i32, i32) {
    %c0_i32 = arith.constant 0 : i32
    %c0_i32_0 = arith.constant 0 : i32
    return %arg0, %c0_i32 : i32, i32
  }
  func.func @transform_1(%arg0: i32) -> (i32, i32) {
    %c0_i32 = arith.constant 0 : i32
    %c0_i32_0 = arith.constant 0 : i32
    return %arg0, %c0_i32 : i32, i32
  }
  func.func @transform_2(%arg0: i32) -> (i32, i32) {
    %c0_i32 = arith.constant 0 : i32
    %c0_i32_0 = arith.constant 0 : i32
    %c0_i32_1 = arith.constant 0 : i32
    return %c0_i32, %c0_i32_0 : i32, i32
  }
  func.func @transform_3(%arg0: i32) -> (i32, i32) {
    %c0_i32 = arith.constant 0 : i32
    %c0_i32_0 = arith.constant 0 : i32
    %c0_i32_1 = arith.constant 0 : i32
    return %c0_i32, %c0_i32_0 : i32, i32
  }
  func.func @transform_4(%arg0: i32) -> (i32, i32) {
    %c0_i32 = arith.constant 0 : i32
    %c0_i32_0 = arith.constant 0 : i32
    return %arg0, %c0_i32 : i32, i32
  }
}

</mosaic_0001>

<bundles_post_ra>
// kernel: fn.1
= control target key start
LH: loop header
LB: loop body
LE: loop exit
PB: predicated region body
PF: predicated region fallthrough
CT: control target
= control target key end

     0   :  { %9 = vsyncpa [#allocation3], 0  ;;  %s640_s15 = smov 0   ;;  %s714_s0 = inlined_call_operand.vmem [shape: f32[16,172], index: 0, kind: input, shape index: {}]   ;;  %s715_s1 = inlined_call_operand.vmem [shape: f32[16,18], index: 1, kind: input, shape index: {}]   ;;  %s716_s2 = inlined_call_operand.hbm [shape: f32[172,129], index: 2, kind: input, shape index: {}]   ;;  %s717_s3 = inlined_call_operand.vmem [shape: f32[18,129], index: 3, kind: input, shape index: {}]   ;;  %s718_s4 = inlined_call_operand.vmem [shape: f32[16,129], index: 4, kind: output, shape index: {}]  }
   0x1 LB: > { %s646_s16 = sadd.s32 4294967295, %s609_s15   ;;  %p531_p0 = scmp.ge.s32.totalorder %s609_s15, 1  ;;  %s609_s15 = sphi %s640_s15, %s15_s15  }
   0x2   : > { %p140_p1 = scmp.lt.s32.totalorder %s609_s15, 3  ;;  %s611_s17 = smov [#allocation2]  }
   0x3   : > { %s152_s18 = sshll.u32 %s611_s17, 4  ;;  %p559_p3 = scmp.eq.s32.totalorder %s646_s16, 0  ;;  %s153_s18 = int_to_ptr.vmem [resolvable:$true] %s152_s18 }
   0x4   : > { %p650_p2 = pnand %p531_p0, %p140_p1  ;;  %s584_s20 = scalar_lea.vmem %s153_s18, 5632 }
   0x5   : > { %p585_p7 = scmp.ne.s32.totalorder %s153_s18, %s584_s20  ;;  %p592_p10 = scmp.lt.s32.totalorder %s153_s18, %s153_s18 }
   0x6   : > { %p555_p4 = pneg %p650_p2  ;;  %p593_p11 = scmp.lt.s32.totalorder %s584_s20, %s584_s20 }
   0x8   : > { %p556_p5 = pnand %p559_p3, %p555_p4  ;;  %p594_p12 = por %p593_p11, %p592_p10 }
   0xa   : > { %p575_p6 = pneg %p556_p5 }
   0xc   : > { %p587_p8 = pnand %p585_p7, %p575_p6 }
   0xe   : > { %p588_p9 = pneg %p587_p8 }
  0x10   : > { %p595_p13 = pnand %p594_p12, %p588_p9 }
  0x12   : > { %598 = shalt.err (!%p595_p13)
}
  0x13   : > { %s612_s21 = smov 256   ;;  %s613_s22 = smov 16  }
  0x14   : > { %558 = dma.hbm_to_vmem [thread:$0]  (!%p556_p5), %s716_s2, 5632, %s153_s18, [#allocation3], %s612_s21, %s612_s21, %s613_s22  }
  0x15   : > { %186 = sbr.rel (%p650_p2) target bundleno = 270 (0x10e), region = 36 }
  0x1a   : > { %604 = dma.done.wait (%p559_p3), [#allocation3], 5632  }
  0x1b   : > { %606 = vsyncadd (%p559_p3), [#allocation3], 4294961664  ;;  %v614_v0 = vmov 0.0   ;;  %v263_v1 = vld [vmem:[#allocation2 + $0xf8] sm:$0xff]  ;;  %v262_v2 = vld [vmem:[#allocation2 + $0xf0] sm:$0xff]  ;;  %p216_p0 = scmp.lt.s32.totalorder %s646_s16, 1 }
  0x1c   : > { %358 = vmatprep.mubr.f32.mxu0 %v614_v0  ;;  %v261_v3 = vld [vmem:[#allocation2 + $0xe8] sm:$0xff]  ;;  %376 = vmatprep.subr.mxu1 %v263_v1  ;;  %v260_v4 = vld [vmem:[#allocation2 + $0xe0] sm:$0xff]  ;;  %v259_v5 = vld [vmem:[#allocation2 + $0xd8] sm:$0xff]  ;;  %vm287_vm0 = vcmask 1041408   ;;  %vm283_vm1 = vcmask 146432   ;;  %vm365_vm2 = vcmask 359424  }
  0x1d   : > { %377 = vmatpush1.msra.mxu1 %v262_v2  ;;  %v258_v6 = vld [vmem:[#allocation2 + $0xd0] sm:$0xff]  ;;  %v257_v7 = vld [vmem:[#allocation2 + $0xc8] sm:$0xff]  ;;  %v256_v8 = vld [vmem:[#allocation2 + $0xc0] sm:$0xff]  ;;  %s721_s16 = smov (!%p216_p0, %s646_s16), 1  ;;  %vm369_vm3 = vcmask 1043456   ;;  %vm448_vm4 = vcmask 7168  }
  0x1e   : > { %378 = vmatprep.subr.mxu1 %v261_v3  ;;  %v255_v9 = vld [vmem:[#allocation2 + $0xb8] sm:$0xff]  ;;  %v254_v10 = vld [vmem:[#allocation2 + $0xb0] sm:$0xff]  ;;  %v253_v11 = vld [vmem:[#allocation2 + $0xa8] sm:$0xff]  ;;  %s538_s25 = sshll.u32 %s721_s16, 3  ;;  %s549_s26 = sshll.u32 %s721_s16, 4 }
  0x1f   : > { %379 = vmatpush1.msra.mxu1 %v260_v4  ;;  %v252_v12 = vld [vmem:[#allocation2 + $0xa0] sm:$0xff]  ;;  %v251_v13 = vld [vmem:[#allocation2 + $0x98] sm:$0xff]  ;;  %v250_v14 = vld [vmem:[#allocation2 + $0x90] sm:$0xff]  ;;  %s224_s9 = scalar_lea.vmem %s715_s1, %s538_s25  ;;  %s699_s18 = scalar_lea.vmem %s714_s0, %s549_s26 }
  0x20   : > { %380 = vmatprep.subr.mxu1 %v259_v5  ;;  %v249_v15 = vld [vmem:[#allocation2 + $0x88] sm:$0xff]  ;;  %v281_v17 = vld [vmem:[%s717_s3 + $0x20] sm:$0x3]  ;;  %v280_v19 = vld [vmem:[%s717_s3 + $0x18] sm:$0xff]  ;;  %s229_s23 = scalar_lea.vmem %s718_s4, %s549_s26 }
  0x21   : > { %381 = vmatpush1.msra.mxu1 %v258_v6  ;;  %v282_v16 = vld [vmem:[%s717_s3 + $0x28] sm:$0x3]  ;;  %v248_v18 = vld [vmem:[#allocation2 + $0x80] sm:$0xff]  ;;  %v247_v20 = vld [vmem:[#allocation2 + $0x78] sm:$0xff] }
  0x22   : > { %382 = vmatprep.subr.mxu1 %v257_v7  ;;  %541 = vmatprep.subr.msk.mxu0 %vm287_vm0, %v282_v16  ;;  %v279_v21 = vld [vmem:[%s717_s3 + $0x10] sm:$0xff]  ;;  %v278_v22 = vld [vmem:[%s717_s3 + $0x8] sm:$0xff]  ;;  %v277_v24 = vld [vmem:[%s717_s3] sm:$0xff] }
  0x23   : > { %383 = vmatpush1.msra.mxu1 %v256_v8  ;;  %542 = vmatpush1.msk.msra.mxu0 %vm287_vm0, %v281_v17  ;;  %v246_v23 = vld [vmem:[#allocation2 + $0x70] sm:$0xff]  ;;  %v245_v25 = vld [vmem:[#allocation2 + $0x68] sm:$0xff]  ;;  %v276_v26 = vld [vmem:[%s224_s9] sm:$0xff] }
  0x24   : > { %384 = vmatprep.subr.mxu1 %v255_v9  ;;  %322 = vmatprep.subr.mxu0 %v280_v19  ;;  %v244_v27 = vld [vmem:[#allocation2 + $0x60] sm:$0xff]  ;;  %v231_v28 = vld [vmem:[%s699_s18 + $0x8] sm:$0xff]  ;;  %v243_v29 = vld [vmem:[#allocation2 + $0x58] sm:$0xff] }
  0x25   : > { %385 = vmatpush1.msra.mxu1 %v254_v10  ;;  %323 = vmatpush1.msra.mxu0 %v279_v21  ;;  %v242_v30 = vld [vmem:[#allocation2 + $0x50] sm:$0xff]  ;;  %v241_v31 = vld [vmem:[#allocation2 + $0x48] sm:$0xff]  ;;  %v240_v32 = vld [vmem:[#allocation2 + $0x40] sm:$0xff] }
  0x26   : > { %386 = vmatprep.subr.mxu1 %v253_v11  ;;  %324 = vmatprep.subr.mxu0 %v278_v22  ;;  %v239_v33 = vld [vmem:[#allocation2 + $0x38] sm:$0xff]  ;;  %v238_v34 = vld [vmem:[#allocation2 + $0x30] sm:$0xff]  ;;  %v237_v35 = vld [vmem:[#allocation2 + $0x28] sm:$0xff] }
  0x27   : > { %387 = vmatpush1.msra.mxu1 %v252_v12  ;;  %325 = vmatpush1.msra.mxu0 %v277_v24  ;;  %v236_v36 = vld [vmem:[#allocation2 + $0x20] sm:$0xff]  ;;  %v235_v37 = vld [vmem:[#allocation2 + $0x18] sm:$0xff]  ;;  %v234_v38 = vld [vmem:[#allocation2 + $0x10] sm:$0xff] }
  0x28   : > { %388 = vmatprep.subr.mxu1 %v251_v13  ;;  %543 = vmatmul.mubr.msk.f32.vlgmr.msra.gmra.mxu0 %vm283_vm1, %v276_v26  ;;  %v233_v39 = vld [vmem:[#allocation2 + $0x8] sm:$0xff]  ;;  %v232_v40 = vld [vmem:[#allocation2] sm:$0xff]  ;;  %v275_v41 = vld [vmem:[#allocation2 + $0x158] sm:$0xf] }
  0x29   : > { %389 = vmatpush1.msra.mxu1 %v250_v14  ;;  %546 = vmatprep.mubr.msk.f32.mxu1 %vm365_vm2, %v231_v28  ;;  %v274_v42 = vld [vmem:[#allocation2 + $0x150] sm:$0xf]  ;;  %v273_v43 = vld [vmem:[#allocation2 + $0x148] sm:$0xff]  ;;  %v272_v44 = vld [vmem:[#allocation2 + $0x140] sm:$0xff] }
  0x2a   : > { %390 = vmatprep.subr.mxu1 %v249_v15  ;;  %v271_v45 = vld [vmem:[#allocation2 + $0x138] sm:$0xff]  ;;  %v270_v46 = vld [vmem:[#allocation2 + $0x130] sm:$0xff]  ;;  %v269_v47 = vld [vmem:[#allocation2 + $0x128] sm:$0xff] }
  0x2b   : > { %391 = vmatpush1.msra.mxu1 %v248_v18  ;;  %v268_v48 = vld [vmem:[#allocation2 + $0x120] sm:$0xff]  ;;  %v267_v49 = vld [vmem:[#allocation2 + $0x118] sm:$0xff]  ;;  %v266_v50 = vld [vmem:[#allocation2 + $0x110] sm:$0xff] }
  0x2c   : > { %392 = vmatprep.subr.mxu1 %v247_v20  ;;  %v265_v51 = vld [vmem:[#allocation2 + $0x108] sm:$0xff]  ;;  %v264_v52 = vld [vmem:[#allocation2 + $0x100] sm:$0xff] }
  0x2d   : > { %393 = vmatpush1.msra.mxu1 %v246_v23  ;;  %v230_v53 = vld [vmem:[%s699_s18] sm:$0xff] }
  0x2e   : > { %394 = vmatprep.subr.mxu1 %v245_v25 }
  0x2f   : > { %395 = vmatpush1.msra.mxu1 %v244_v27 }
  0x30   : > { %396 = vmatprep.subr.mxu1 %v243_v29 }
  0x31   : > { %397 = vmatpush1.msra.mxu1 %v242_v30 }
  0x32   : > { %398 = vmatprep.subr.mxu1 %v241_v31 }
  0x33   : > { %399 = vmatpush1.msra.mxu1 %v240_v32 }
  0x34   : > { %400 = vmatprep.subr.mxu1 %v239_v33 }
  0x35   : > { %401 = vmatpush1.msra.mxu1 %v238_v34 }
  0x36   : > { %402 = vmatprep.subr.mxu1 %v237_v35 }
  0x37   : > { %403 = vmatpush1.msra.mxu1 %v236_v36 }
  0x38   : > { %404 = vmatprep.subr.mxu1 %v235_v37 }
  0x39   : > { %405 = vmatpush1.msra.mxu1 %v234_v38 }
  0x3a   : > { %406 = vmatprep.subr.mxu1 %v233_v39 }
  0x3b   : > { %407 = vmatpush1.msra.mxu1 %v232_v40 }
  0x3c   : > { %544 = vmatprep.subr.msk.mxu1 %vm369_vm3, %v275_v41 }
  0x3d   : > { %545 = vmatpush2.msk.msra.mxu1 %vm369_vm3, %v274_v42 }
  0x3e   : > { %430 = vmatprep.subr.mxu1 %v273_v43 }
  0x3f   : > { %431 = vmatpush2.msra.mxu1 %v272_v44 }
  0x40   : > { %432 = vmatprep.subr.mxu1 %v271_v45 }
  0x41   : > { %433 = vmatpush2.msra.mxu1 %v270_v46 }
  0x42   : > { %434 = vmatprep.subr.mxu1 %v269_v47 }
  0x43   : > { %435 = vmatpush2.msra.mxu1 %v268_v48 }
  0x44   : > { %436 = vmatprep.subr.mxu1 %v267_v49 }
  0x45   : > { %437 = vmatpush2.msra.mxu1 %v266_v50 }
  0x46   : > { %438 = vmatprep.subr.mxu1 %v265_v51 }
  0x47   : > { %439 = vmatpush2.msra.mxu1 %v264_v52 }
  0x48   : > { %441 = vmatmul.mubr.f32.vlgmr.msra.gmra.mxu1 %v230_v53 }
  0xe8   : > { %v360_v54 = vpop.f32.mrf.mxu0 }
  0xea   : > { %v362_v57 = vpop.f32.mrf.mxu0 }
 0x108   : > { %v442_v55 = vpop.f32.mrf.mxu1 }
 0x109   : > { %v443_v56 = vadd.f32 %v442_v55, %v360_v54 }
 0x10a   : > { %v444_v58 = vpop.f32.mrf.mxu1 }
 0x10b   : > { %447 = vst [vmem:[%s229_s23] sm:$0xff] %v443_v56  ;;  %v445_v59 = vadd.f32 %v444_v58, %v362_v57 }
 0x10d   : > { %449 = vst.msk [vmem:[%s229_s23 + $0x8] sm:$0xff] %vm448_vm4, %v445_v59 }
 0x10e PF: > { %s15_s15 = sadd.s32 1, %s609_s15  }
 0x10f   : > { %p12_p1 = scmp.ge.s32.totalorder %s15_s15, 4  }
 0x111   :  { %14 = sbr.rel (!%p12_p1) target bundleno = 1 (0x1), region = 74 }
 0x116   :  { %471 = vsyncpa [#allocation3], 1 }
 0x117   :  { %473 = vsyncpa [#allocation3 + $0x1], 1 }

// kernel: fn.1
= control target key start
LH: loop header
LB: loop body
LE: loop exit
PB: predicated region body
PF: predicated region fallthrough
CT: control target
= control target key end

     0   :  { %9 = vsyncpa [#allocation3], 0  ;;  %s640_s15 = smov 0   ;;  %s714_s0 = inlined_call_operand.vmem [shape: f32[16,172], index: 0, kind: input, shape index: {}]   ;;  %s715_s1 = inlined_call_operand.vmem [shape: f32[16,18], index: 1, kind: input, shape index: {}]   ;;  %s716_s2 = inlined_call_operand.hbm [shape: f32[172,129], index: 2, kind: input, shape index: {}]   ;;  %s717_s3 = inlined_call_operand.vmem [shape: f32[18,129], index: 3, kind: input, shape index: {}]   ;;  %s718_s4 = inlined_call_operand.vmem [shape: f32[16,129], index: 4, kind: output, shape index: {}]  }
   0x1 LB: > { %s646_s16 = sadd.s32 4294967295, %s609_s15   ;;  %p531_p0 = scmp.ge.s32.totalorder %s609_s15, 1  ;;  %s609_s15 = sphi %s640_s15, %s15_s15  }
   0x2   : > { %p140_p1 = scmp.lt.s32.totalorder %s609_s15, 3  ;;  %s611_s17 = smov [#allocation2]  }
   0x3   : > { %s152_s18 = sshll.u32 %s611_s17, 4  ;;  %p559_p3 = scmp.eq.s32.totalorder %s646_s16, 0  ;;  %s153_s18 = int_to_ptr.vmem [resolvable:$true] %s152_s18 }
   0x4   : > { %p650_p2 = pnand %p531_p0, %p140_p1  ;;  %s584_s20 = scalar_lea.vmem %s153_s18, 5632 }
   0x5   : > { %p585_p7 = scmp.ne.s32.totalorder %s153_s18, %s584_s20  ;;  %p592_p10 = scmp.lt.s32.totalorder %s153_s18, %s153_s18 }
   0x6   : > { %p555_p4 = pneg %p650_p2  ;;  %p593_p11 = scmp.lt.s32.totalorder %s584_s20, %s584_s20 }
   0x8   : > { %p556_p5 = pnand %p559_p3, %p555_p4  ;;  %p594_p12 = por %p593_p11, %p592_p10 }
   0xa   : > { %p575_p6 = pneg %p556_p5 }
   0xc   : > { %p587_p8 = pnand %p585_p7, %p575_p6 }
   0xe   : > { %p588_p9 = pneg %p587_p8 }
  0x10   : > { %p595_p13 = pnand %p594_p12, %p588_p9 }
  0x12   : > { %598 = shalt.err (!%p595_p13)
}
  0x13   : > { %s612_s21 = smov 256   ;;  %s613_s22 = smov 16  }
  0x14   : > { %558 = dma.hbm_to_vmem [thread:$0]  (!%p556_p5), %s716_s2, 5632, %s153_s18, [#allocation3], %s612_s21, %s612_s21, %s613_s22  }
  0x15   : > { %186 = sbr.rel (%p650_p2) target bundleno = 270 (0x10e), region = 36 }
  0x1a   : > { %604 = dma.done.wait (%p559_p3), [#allocation3], 5632  }
  0x1b   : > { %606 = vsyncadd (%p559_p3), [#allocation3], 4294961664  ;;  %v614_v0 = vmov 0.0   ;;  %v263_v1 = vld [vmem:[#allocation2 + $0xf8] sm:$0xff]  ;;  %v262_v2 = vld [vmem:[#allocation2 + $0xf0] sm:$0xff]  ;;  %p216_p0 = scmp.lt.s32.totalorder %s646_s16, 1 }
  0x1c   : > { %358 = vmatprep.mubr.f32.mxu0 %v614_v0  ;;  %v261_v3 = vld [vmem:[#allocation2 + $0xe8] sm:$0xff]  ;;  %376 = vmatprep.subr.mxu1 %v263_v1  ;;  %v260_v4 = vld [vmem:[#allocation2 + $0xe0] sm:$0xff]  ;;  %v259_v5 = vld [vmem:[#allocation2 + $0xd8] sm:$0xff]  ;;  %vm287_vm0 = vcmask 1041408   ;;  %vm283_vm1 = vcmask 146432   ;;  %vm365_vm2 = vcmask 359424  }
  0x1d   : > { %377 = vmatpush1.msra.mxu1 %v262_v2  ;;  %v258_v6 = vld [vmem:[#allocation2 + $0xd0] sm:$0xff]  ;;  %v257_v7 = vld [vmem:[#allocation2 + $0xc8] sm:$0xff]  ;;  %v256_v8 = vld [vmem:[#allocation2 + $0xc0] sm:$0xff]  ;;  %s721_s16 = smov (!%p216_p0, %s646_s16), 1  ;;  %vm369_vm3 = vcmask 1043456   ;;  %vm448_vm4 = vcmask 7168  }
  0x1e   : > { %378 = vmatprep.subr.mxu1 %v261_v3  ;;  %v255_v9 = vld [vmem:[#allocation2 + $0xb8] sm:$0xff]  ;;  %v254_v10 = vld [vmem:[#allocation2 + $0xb0] sm:$0xff]  ;;  %v253_v11 = vld [vmem:[#allocation2 + $0xa8] sm:$0xff]  ;;  %s538_s25 = sshll.u32 %s721_s16, 3  ;;  %s549_s26 = sshll.u32 %s721_s16, 4 }
  0x1f   : > { %379 = vmatpush1.msra.mxu1 %v260_v4  ;;  %v252_v12 = vld [vmem:[#allocation2 + $0xa0] sm:$0xff]  ;;  %v251_v13 = vld [vmem:[#allocation2 + $0x98] sm:$0xff]  ;;  %v250_v14 = vld [vmem:[#allocation2 + $0x90] sm:$0xff]  ;;  %s224_s9 = scalar_lea.vmem %s715_s1, %s538_s25  ;;  %s699_s18 = scalar_lea.vmem %s714_s0, %s549_s26 }
  0x20   : > { %380 = vmatprep.subr.mxu1 %v259_v5  ;;  %v249_v15 = vld [vmem:[#allocation2 + $0x88] sm:$0xff]  ;;  %v281_v17 = vld [vmem:[%s717_s3 + $0x20] sm:$0x3]  ;;  %v280_v19 = vld [vmem:[%s717_s3 + $0x18] sm:$0xff]  ;;  %s229_s23 = scalar_lea.vmem %s718_s4, %s549_s26 }
  0x21   : > { %381 = vmatpush1.msra.mxu1 %v258_v6  ;;  %v282_v16 = vld [vmem:[%s717_s3 + $0x28] sm:$0x3]  ;;  %v248_v18 = vld [vmem:[#allocation2 + $0x80] sm:$0xff]  ;;  %v247_v20 = vld [vmem:[#allocation2 + $0x78] sm:$0xff] }
  0x22   : > { %382 = vmatprep.subr.mxu1 %v257_v7  ;;  %541 = vmatprep.subr.msk.mxu0 %vm287_vm0, %v282_v16  ;;  %v279_v21 = vld [vmem:[%s717_s3 + $0x10] sm:$0xff]  ;;  %v278_v22 = vld [vmem:[%s717_s3 + $0x8] sm:$0xff]  ;;  %v277_v24 = vld [vmem:[%s717_s3] sm:$0xff] }
  0x23   : > { %383 = vmatpush1.msra.mxu1 %v256_v8  ;;  %542 = vmatpush1.msk.msra.mxu0 %vm287_vm0, %v281_v17  ;;  %v246_v23 = vld [vmem:[#allocation2 + $0x70] sm:$0xff]  ;;  %v245_v25 = vld [vmem:[#allocation2 + $0x68] sm:$0xff]  ;;  %v276_v26 = vld [vmem:[%s224_s9] sm:$0xff] }
  0x24   : > { %384 = vmatprep.subr.mxu1 %v255_v9  ;;  %322 = vmatprep.subr.mxu0 %v280_v19  ;;  %v244_v27 = vld [vmem:[#allocation2 + $0x60] sm:$0xff]  ;;  %v231_v28 = vld [vmem:[%s699_s18 + $0x8] sm:$0xff]  ;;  %v243_v29 = vld [vmem:[#allocation2 + $0x58] sm:$0xff] }
  0x25   : > { %385 = vmatpush1.msra.mxu1 %v254_v10  ;;  %323 = vmatpush1.msra.mxu0 %v279_v21  ;;  %v242_v30 = vld [vmem:[#allocation2 + $0x50] sm:$0xff]  ;;  %v241_v31 = vld [vmem:[#allocation2 + $0x48] sm:$0xff]  ;;  %v240_v32 = vld [vmem:[#allocation2 + $0x40] sm:$0xff] }
  0x26   : > { %386 = vmatprep.subr.mxu1 %v253_v11  ;;  %324 = vmatprep.subr.mxu0 %v278_v22  ;;  %v239_v33 = vld [vmem:[#allocation2 + $0x38] sm:$0xff]  ;;  %v238_v34 = vld [vmem:[#allocation2 + $0x30] sm:$0xff]  ;;  %v237_v35 = vld [vmem:[#allocation2 + $0x28] sm:$0xff] }
  0x27   : > { %387 = vmatpush1.msra.mxu1 %v252_v12  ;;  %325 = vmatpush1.msra.mxu0 %v277_v24  ;;  %v236_v36 = vld [vmem:[#allocation2 + $0x20] sm:$0xff]  ;;  %v235_v37 = vld [vmem:[#allocation2 + $0x18] sm:$0xff]  ;;  %v234_v38 = vld [vmem:[#allocation2 + $0x10] sm:$0xff] }
  0x28   : > { %388 = vmatprep.subr.mxu1 %v251_v13  ;;  %543 = vmatmul.mubr.msk.f32.vlgmr.msra.gmra.mxu0 %vm283_vm1, %v276_v26  ;;  %v233_v39 = vld [vmem:[#allocation2 + $0x8] sm:$0xff]  ;;  %v232_v40 = vld [vmem:[#allocation2] sm:$0xff]  ;;  %v275_v41 = vld [vmem:[#allocation2 + $0x158] sm:$0xf] }
  0x29   : > { %389 = vmatpush1.msra.mxu1 %v250_v14  ;;  %546 = vmatprep.mubr.msk.f32.mxu1 %vm365_vm2, %v231_v28  ;;  %v274_v42 = vld [vmem:[#allocation2 + $0x150] sm:$0xf]  ;;  %v273_v43 = vld [vmem:[#allocation2 + $0x148] sm:$0xff]  ;;  %v272_v44 = vld [vmem:[#allocation2 + $0x140] sm:$0xff] }
  0x2a   : > { %390 = vmatprep.subr.mxu1 %v249_v15  ;;  %v271_v45 = vld [vmem:[#allocation2 + $0x138] sm:$0xff]  ;;  %v270_v46 = vld [vmem:[#allocation2 + $0x130] sm:$0xff]  ;;  %v269_v47 = vld [vmem:[#allocation2 + $0x128] sm:$0xff] }
  0x2b   : > { %391 = vmatpush1.msra.mxu1 %v248_v18  ;;  %v268_v48 = vld [vmem:[#allocation2 + $0x120] sm:$0xff]  ;;  %v267_v49 = vld [vmem:[#allocation2 + $0x118] sm:$0xff]  ;;  %v266_v50 = vld [vmem:[#allocation2 + $0x110] sm:$0xff] }
  0x2c   : > { %392 = vmatprep.subr.mxu1 %v247_v20  ;;  %v265_v51 = vld [vmem:[#allocation2 + $0x108] sm:$0xff]  ;;  %v264_v52 = vld [vmem:[#allocation2 + $0x100] sm:$0xff] }
  0x2d   : > { %393 = vmatpush1.msra.mxu1 %v246_v23  ;;  %v230_v53 = vld [vmem:[%s699_s18] sm:$0xff] }
  0x2e   : > { %394 = vmatprep.subr.mxu1 %v245_v25 }
  0x2f   : > { %395 = vmatpush1.msra.mxu1 %v244_v27 }
  0x30   : > { %396 = vmatprep.subr.mxu1 %v243_v29 }
  0x31   : > { %397 = vmatpush1.msra.mxu1 %v242_v30 }
  0x32   : > { %398 = vmatprep.subr.mxu1 %v241_v31 }
  0x33   : > { %399 = vmatpush1.msra.mxu1 %v240_v32 }
  0x34   : > { %400 = vmatprep.subr.mxu1 %v239_v33 }
  0x35   : > { %401 = vmatpush1.msra.mxu1 %v238_v34 }
  0x36   : > { %402 = vmatprep.subr.mxu1 %v237_v35 }
  0x37   : > { %403 = vmatpush1.msra.mxu1 %v236_v36 }
  0x38   : > { %404 = vmatprep.subr.mxu1 %v235_v37 }
  0x39   : > { %405 = vmatpush1.msra.mxu1 %v234_v38 }
  0x3a   : > { %406 = vmatprep.subr.mxu1 %v233_v39 }
  0x3b   : > { %407 = vmatpush1.msra.mxu1 %v232_v40 }
  0x3c   : > { %544 = vmatprep.subr.msk.mxu1 %vm369_vm3, %v275_v41 }
  0x3d   : > { %545 = vmatpush2.msk.msra.mxu1 %vm369_vm3, %v274_v42 }
  0x3e   : > { %430 = vmatprep.subr.mxu1 %v273_v43 }
  0x3f   : > { %431 = vmatpush2.msra.mxu1 %v272_v44 }
  0x40   : > { %432 = vmatprep.subr.mxu1 %v271_v45 }
  0x41   : > { %433 = vmatpush2.msra.mxu1 %v270_v46 }
  0x42   : > { %434 = vmatprep.subr.mxu1 %v269_v47 }
  0x43   : > { %435 = vmatpush2.msra.mxu1 %v268_v48 }
  0x44   : > { %436 = vmatprep.subr.mxu1 %v267_v49 }
  0x45   : > { %437 = vmatpush2.msra.mxu1 %v266_v50 }
  0x46   : > { %438 = vmatprep.subr.mxu1 %v265_v51 }
  0x47   : > { %439 = vmatpush2.msra.mxu1 %v264_v52 }
  0x48   : > { %441 = vmatmul.mubr.f32.vlgmr.msra.gmra.mxu1 %v230_v53 }
  0xe8   : > { %v360_v54 = vpop.f32.mrf.mxu0 }
  0xea   : > { %v362_v57 = vpop.f32.mrf.mxu0 }
 0x108   : > { %v442_v55 = vpop.f32.mrf.mxu1 }
 0x109   : > { %v443_v56 = vadd.f32 %v442_v55, %v360_v54 }
 0x10a   : > { %v444_v58 = vpop.f32.mrf.mxu1 }
 0x10b   : > { %447 = vst [vmem:[%s229_s23] sm:$0xff] %v443_v56  ;;  %v445_v59 = vadd.f32 %v444_v58, %v362_v57 }
 0x10d   : > { %449 = vst.msk [vmem:[%s229_s23 + $0x8] sm:$0xff] %vm448_vm4, %v445_v59 }
 0x10e PF: > { %s15_s15 = sadd.s32 1, %s609_s15  }
 0x10f   : > { %p12_p1 = scmp.ge.s32.totalorder %s15_s15, 4  }
 0x111   :  { %14 = sbr.rel (!%p12_p1) target bundleno = 1 (0x1), region = 74 }
 0x116   :  { %471 = vsyncpa [#allocation3], 1 }
 0x117   :  { %473 = vsyncpa [#allocation3 + $0x1], 1 }

</bundles_post_ra>
